<compile_context>
chip_gen: v7x
topology: tpu7x:2x2x1
jax: 0.10.0
libtpu: 0.0.40
codegen_flags: <defaults>
</compile_context>

<pallas_src>
import functools

import jax
import jax.numpy as jnp
from jax.experimental import pallas as pl
from jax.experimental.pallas import tpu as pltpu

N_LABELS = 25


def _round_up(x, m):
    return ((x + m - 1) // m) * m


def _vmem_estimate(tb, H, N):
    """Rough VMEM working-set estimate (bytes) for a given batch tile."""
    x_tiles = 2 * tb * H * 4                 # f32 x tile, double-buffered
    y_tiles = 2 * tb * N * 4                 # labels tile, double-buffered
    weights = 2 * (H * 256 * 2 + 256 * 4 + 256 * N * 4 + N * 4)   # resident
    interm = tb * H * 2 + 2 * tb * 256 * 4 + 4 * tb * N * 4       # activations
    return x_tiles + y_tiles + weights + interm


def _choose_batch_tile(B, H, N, tile_b):
    """Pick the batch tile: big (up to tile_b), VMEM-safe, >=2 tiles if possible."""
    if B <= 8:
        # Single block equal to the full batch dim (allowed by the (8,128) rule).
        return B
    tb = min(tile_b, (B // 8) * 8)
    # Keep at least 2 batch tiles so both v7x TensorCores get work.
    if pl.cdiv(B, tb) < 2:
        tb = max(8, _round_up(pl.cdiv(B, 2), 8))
    # Back off to stay inside a ~40 MiB VMEM working set (v7x physical = 64 MiB).
    while tb > 8 and _vmem_estimate(tb, H, N) > 40 * 1024 * 1024:
        tb = max(8, _round_up(tb // 2, 8))
    return tb


def _mlc_loss_kernel(nrows_ref, x_ref, y_ref, w1_ref, b1_ref, w23_ref, b23_ref,
                     partial_ref, *, tile_b, mask_rows):
    # ---- feedforward hot path ----
    # x arrives f32 straight from HBM; cast to bf16 here (hides under MXU).
    x = x_ref[...].astype(jnp.bfloat16)                               # (TB, H)
    h = jnp.dot(x, w1_ref[...], preferred_element_type=jnp.float32)   # (TB, 256)
    h = jnp.maximum(h + b1_ref[...], 0.0)                             # +b1, ReLU
    # Dropout(p=0.2): identity (eval mode).
    # Folded Linear(256,25) @ Linear(25,25); kept f32 (tiny, parity with torch).
    z = jnp.dot(h, w23_ref[...], preferred_element_type=jnp.float32)  # (TB, 25)
    z = z + b23_ref[...]          # b23 already folds in b3 and the +1e-8 shift
    # Dropout(p=0.0): identity.

    # ---- BCEWithLogitsLoss partial sum (numerically stable form) ----
    y = y_ref[...].astype(jnp.float32)
    per_elem = jnp.maximum(z, 0.0) - z * y + jnp.log1p(jnp.exp(-jnp.abs(z)))

    if mask_rows:
        # Ragged trailing tile: discard overhang rows with a *select* so any
        # NaN/inf computed from garbage rows cannot propagate into the sum.
        valid_rows = nrows_ref[0]
        row = pl.program_id(0) * tile_b + jax.lax.broadcasted_iota(
            jnp.int32, per_elem.shape, 0)
        per_elem = jnp.where(row < valid_rows, per_elem, 0.0)

    partial_ref[0, 0] = jnp.sum(per_elem)


def multi_label_cls_loss(inputs, labels, params, *, tile_b=1024):
    """inputs: (B, H) f32, labels: (B, 25) (any 0/1 dtype), params: dict."""
    B, H = inputs.shape
    N = labels.shape[1]

    # Fold Linear(256,25) @ Linear(25,25) into one affine map (exact: no
    # nonlinearity and dropout p=0.0 between them) plus the +1e-8 logit shift.
    w23 = (params["w2"] @ params["w3"]).astype(jnp.float32)               # (256, 25)
    b23 = (params["b2"] @ params["w3"] + params["b3"] + 1e-8).astype(jnp.float32)

    # Weights are tiny (H*256 etc.) so a wrapper-side cast is negligible;
    # the hot x / labels streams are NOT touched in the wrapper.
    w1 = params["w1"].astype(jnp.bfloat16)
    b1 = params["b1"].astype(jnp.float32)

    tb = _choose_batch_tile(B, H, N, tile_b)
    num_tiles = pl.cdiv(B, tb)
    mask_rows = (B % tb) != 0
    nrows = jnp.array([B], dtype=jnp.int32)

    kernel = functools.partial(_mlc_loss_kernel, tile_b=tb, mask_rows=mask_rows)

    grid_spec = pltpu.PrefetchScalarGridSpec(
        num_scalar_prefetch=1,
        grid=(num_tiles,),
        in_specs=[
            pl.BlockSpec((tb, H), lambda i, n: (i, 0)),      # x tile (f32)
            pl.BlockSpec((tb, N), lambda i, n: (i, 0)),      # labels tile
            pl.BlockSpec((H, 256), lambda i, n: (0, 0)),     # w1 (resident)
            pl.BlockSpec((1, 256), lambda i, n: (0, 0)),     # b1 (resident)
            pl.BlockSpec((256, N), lambda i, n: (0, 0)),     # w23 (resident)
            pl.BlockSpec((1, N), lambda i, n: (0, 0)),       # b23 (resident)
        ],
        out_specs=pl.BlockSpec((1, 1), lambda i, n: (i, 0),
                               memory_space=pltpu.MemorySpace.SMEM),
    )

    partials = pl.pallas_call(
        kernel,
        out_shape=jax.ShapeDtypeStruct((num_tiles, 1), jnp.float32),
        grid_spec=grid_spec,
        compiler_params=pltpu.CompilerParams(
            dimension_semantics=("parallel",),
            vmem_limit_bytes=48 * 1024 * 1024,   # safe on v7x's 64 MiB physical
        ),
    )(nrows, inputs, labels, w1, b1, w23, b23)

    # Final tiny reduction + mean over the true global element count.
    return jnp.sum(partials) / (B * N)


def init_params(key, hidden_size):
    """Deterministic init mimicking PyTorch Linear default (uniform +/- 1/sqrt(fan_in))."""
    def linear(k, fan_in, fan_out):
        kw, kb = jax.random.split(k)
        bound = 1.0 / jnp.sqrt(fan_in)
        w = jax.random.uniform(kw, (fan_in, fan_out), jnp.float32, -bound, bound)
        b = jax.random.uniform(kb, (1, fan_out), jnp.float32, -bound, bound)
        return w, b

    k1, k2, k3 = jax.random.split(key, 3)
    w1, b1 = linear(k1, hidden_size, 256)
    w2, b2 = linear(k2, 256, N_LABELS)
    w3, b3 = linear(k3, N_LABELS, N_LABELS)
    return {"w1": w1, "b1": b1, "w2": w2, "b2": b2, "w3": w3, "b3": b3}


def _reference_loss(inputs, labels, p):
    """Full-precision (f32) reference of the eval-mode forward + BCE loss."""
    h = jnp.maximum(inputs @ p["w1"] + p["b1"], 0.0)
    z = h @ p["w2"] + p["b2"]
    z = z @ p["w3"] + p["b3"]
    z = z + 1e-8
    per = jnp.maximum(z, 0.0) - z * labels + jnp.log1p(jnp.exp(-jnp.abs(z)))
    return jnp.mean(per)


if __name__ == "__main__":
    key = jax.random.PRNGKey(0)
    k_in, k_lab, k_par = jax.random.split(key, 3)

    B, H = 8, 32            # batch, lstm_hidden_size (small synthetic shapes)

    inputs = jax.random.normal(k_in, (B, H), jnp.float32)
    labels = jax.random.bernoulli(k_lab, 0.3, (B, N_LABELS)).astype(jnp.float32)
    params = init_params(k_par, H)

    loss = multi_label_cls_loss(inputs, labels, params)
    loss = jax.block_until_ready(loss)
    ref = _reference_loss(inputs, labels, params)
    # bf16 first-matmul operands => compare against f32 reference with a
    # bf16-appropriate tolerance.
    assert jnp.allclose(loss, ref, rtol=1e-2, atol=1e-2), (loss, ref)

    # Ragged-batch path: exercises the unpadded trailing tile + row mask and
    # the multi-tile ("parallel") grid.
    B2 = 13
    inputs2 = jax.random.normal(jax.random.PRNGKey(1), (B2, H), jnp.float32)
    labels2 = jax.random.bernoulli(jax.random.PRNGKey(2), 0.3,
                                   (B2, N_LABELS)).astype(jnp.float32)
    loss2 = jax.block_until_ready(multi_label_cls_loss(inputs2, labels2, params))
    ref2 = _reference_loss(inputs2, labels2, params)
    assert jnp.allclose(loss2, ref2, rtol=1e-2, atol=1e-2), (loss2, ref2)

    print("KERNEL_OK")
</pallas_src>

<mosaic_0001>
module attributes {stable_mosaic.version = 11 : i64} {
  func.func @_mlc_loss_kernel(%arg0: i32, %arg1: memref<1xi32, #tpu.memory_space<smem>>, %arg2: memref<8x32xf32, #tpu.memory_space<vmem>>, %arg3: memref<8x25xf32, #tpu.memory_space<vmem>>, %arg4: memref<32x256xbf16, #tpu.memory_space<vmem>>, %arg5: memref<1x256xf32, #tpu.memory_space<vmem>>, %arg6: memref<256x25xf32, #tpu.memory_space<vmem>>, %arg7: memref<1x25xf32, #tpu.memory_space<vmem>>, %arg8: memref<1x1xf32, #tpu.memory_space<smem>>) attributes {dimension_semantics = [#tpu.dimension_semantics<parallel>], iteration_bounds = array<i64: 1>, scalar_prefetch = 1 : i64, scratch_operands = 0 : i64, tpu.core_type = #tpu.core_type<tc>, window_params = [{transform_indices = @transform_0, window_bounds = array<i64: 8, 32>}, {transform_indices = @transform_1, window_bounds = array<i64: 8, 25>}, {pipeline_mode = #tpu.pipeline_mode<synchronous>, transform_indices = @transform_2, window_bounds = array<i64: 32, 256>}, {pipeline_mode = #tpu.pipeline_mode<synchronous>, transform_indices = @transform_3, window_bounds = array<i64: 1, 256>}, {pipeline_mode = #tpu.pipeline_mode<synchronous>, transform_indices = @transform_4, window_bounds = array<i64: 256, 25>}, {pipeline_mode = #tpu.pipeline_mode<synchronous>, transform_indices = @transform_5, window_bounds = array<i64: 1, 25>}, {transform_indices = @transform_6, window_bounds = array<i64: 1, 1>}]} {
    %c0 = arith.constant 0 : index
    %c0_0 = arith.constant 0 : index
    %0 = vector.load %arg2[%c0, %c0_0] : memref<8x32xf32, #tpu.memory_space<vmem>>, vector<8x32xf32>
    %1 = arith.truncf %0 : vector<8x32xf32> to vector<8x32xbf16>
    %c0_1 = arith.constant 0 : index
    %c0_2 = arith.constant 0 : index
    %2 = vector.load %arg4[%c0_1, %c0_2] : memref<32x256xbf16, #tpu.memory_space<vmem>>, vector<32x256xbf16>
    %cst = arith.constant dense<0.000000e+00> : vector<8x256xf32>
    %3 = tpu.matmul %1, %2, %cst {dimension_numbers = #tpu.dot_dimension_numbers<[1], [0], [0], [1], [0, 0, 1, 1], [], []>} : vector<8x32xbf16>, vector<32x256xbf16>, vector<8x256xf32> -> vector<8x256xf32>
    %c0_3 = arith.constant 0 : index
    %c0_4 = arith.constant 0 : index
    %4 = vector.load %arg5[%c0_3, %c0_4] : memref<1x256xf32, #tpu.memory_space<vmem>>, vector<1x256xf32>
    %5 = vector.broadcast %4 : vector<1x256xf32> to vector<8x256xf32>
    %6 = arith.addf %3, %5 : vector<8x256xf32>
    %cst_5 = arith.constant 0.000000e+00 : f32
    %7 = vector.broadcast %cst_5 : f32 to vector<8x256xf32>
    %8 = arith.maximumf %6, %7 : vector<8x256xf32>
    %c0_6 = arith.constant 0 : index
    %c0_7 = arith.constant 0 : index
    %9 = vector.load %arg6[%c0_6, %c0_7] : memref<256x25xf32, #tpu.memory_space<vmem>>, vector<256x25xf32>
    %cst_8 = arith.constant dense<0.000000e+00> : vector<8x25xf32>
    %10 = tpu.matmul %8, %9, %cst_8 {dimension_numbers = #tpu.dot_dimension_numbers<[1], [0], [0], [1], [0, 0, 1, 1], [], []>} : vector<8x256xf32>, vector<256x25xf32>, vector<8x25xf32> -> vector<8x25xf32>
    %c0_9 = arith.constant 0 : index
    %c0_10 = arith.constant 0 : index
    %11 = vector.load %arg7[%c0_9, %c0_10] : memref<1x25xf32, #tpu.memory_space<vmem>>, vector<1x25xf32>
    %12 = vector.broadcast %11 : vector<1x25xf32> to vector<8x25xf32>
    %13 = arith.addf %10, %12 : vector<8x25xf32>
    %c0_11 = arith.constant 0 : index
    %c0_12 = arith.constant 0 : index
    %14 = vector.load %arg3[%c0_11, %c0_12] : memref<8x25xf32, #tpu.memory_space<vmem>>, vector<8x25xf32>
    %cst_13 = arith.constant 0.000000e+00 : f32
    %15 = vector.broadcast %cst_13 : f32 to vector<8x25xf32>
    %16 = arith.maximumf %13, %15 : vector<8x25xf32>
    %17 = arith.mulf %13, %14 : vector<8x25xf32>
    %18 = arith.subf %16, %17 : vector<8x25xf32>
    %19 = math.absf %13 : vector<8x25xf32>
    %cst_14 = arith.constant 0.000000e+00 : f32
    %20 = vector.broadcast %cst_14 : f32 to vector<8x25xf32>
    %21 = arith.subf %20, %19 : vector<8x25xf32>
    %22 = math.exp %21 : vector<8x25xf32>
    %23 = math.log1p %22 : vector<8x25xf32>
    %24 = arith.addf %18, %23 : vector<8x25xf32>
    %25 = vector.shape_cast %24 : vector<8x25xf32> to vector<1x8x25xf32>
    %cst_15 = arith.constant dense<0.000000e+00> : vector<1xf32>
    %26 = vector.multi_reduction <add>, %25, %cst_15 [1, 2] : vector<1x8x25xf32> to vector<1xf32>
    %27 = vector.shape_cast %26 : vector<1xf32> to vector<1x1x1xf32>
    %28 = vector.extract %27[0, 0, 0] : f32 from vector<1x1x1xf32>
    %c0_16 = arith.constant 0 : index
    %c0_17 = arith.constant 0 : index
    %29 = memref.load %arg8[%c0_16, %c0_17] : memref<1x1xf32, #tpu.memory_space<smem>>
    memref.store %28, %arg8[%c0_16, %c0_17] : memref<1x1xf32, #tpu.memory_space<smem>>
    return
  }
  func.func @transform_0(%arg0: i32, %arg1: memref<1xi32, #tpu.memory_space<smem>>) -> (i32, i32) {
    %c0_i32 = arith.constant 0 : i32
    %c0_i32_0 = arith.constant 0 : i32
    return %arg0, %c0_i32 : i32, i32
  }
  func.func @transform_1(%arg0: i32, %arg1: memref<1xi32, #tpu.memory_space<smem>>) -> (i32, i32) {
    %c0_i32 = arith.constant 0 : i32
    %c0_i32_0 = arith.constant 0 : i32
    return %arg0, %c0_i32 : i32, i32
  }
  func.func @transform_2(%arg0: i32, %arg1: memref<1xi32, #tpu.memory_space<smem>>) -> (i32, i32) {
    %c0_i32 = arith.constant 0 : i32
    %c0_i32_0 = arith.constant 0 : i32
    %c0_i32_1 = arith.constant 0 : i32
    return %c0_i32, %c0_i32_0 : i32, i32
  }
  func.func @transform_3(%arg0: i32, %arg1: memref<1xi32, #tpu.memory_space<smem>>) -> (i32, i32) {
    %c0_i32 = arith.constant 0 : i32
    %c0_i32_0 = arith.constant 0 : i32
    %c0_i32_1 = arith.constant 0 : i32
    return %c0_i32, %c0_i32_0 : i32, i32
  }
  func.func @transform_4(%arg0: i32, %arg1: memref<1xi32, #tpu.memory_space<smem>>) -> (i32, i32) {
    %c0_i32 = arith.constant 0 : i32
    %c0_i32_0 = arith.constant 0 : i32
    %c0_i32_1 = arith.constant 0 : i32
    return %c0_i32, %c0_i32_0 : i32, i32
  }
  func.func @transform_5(%arg0: i32, %arg1: memref<1xi32, #tpu.memory_space<smem>>) -> (i32, i32) {
    %c0_i32 = arith.constant 0 : i32
    %c0_i32_0 = arith.constant 0 : i32
    %c0_i32_1 = arith.constant 0 : i32
    return %c0_i32, %c0_i32_0 : i32, i32
  }
  func.func @transform_6(%arg0: i32, %arg1: memref<1xi32, #tpu.memory_space<smem>>) -> (i32, i32) {
    %c0_i32 = arith.constant 0 : i32
    %c0_i32_0 = arith.constant 0 : i32
    return %arg0, %c0_i32 : i32, i32
  }
}

</mosaic_0001>

<bundles_post_ra>
// kernel: tpu_custom_call.1
= control target key start
LH: loop header
LB: loop body
LE: loop exit
PB: predicated region body
PF: predicated region fallthrough
CT: control target
= control target key end

     0   :  { %v364_v2 = vmov 0   ;;  %vm65_vm0 = vcmask 261120   ;;  %s538_s0 = inlined_call_operand.<no memory space> [shape: s32[1], index: 0, kind: input, shape index: {}]   ;;  %s539_s1 = inlined_call_operand.vmem [shape: f32[8,32], index: 1, kind: input, shape index: {}]   ;;  %s540_s2 = inlined_call_operand.vmem [shape: f32[8,25], index: 2, kind: input, shape index: {}]   ;;  %s541_s3 = inlined_call_operand.vmem [shape: bf16[32,256], index: 3, kind: input, shape index: {}]   ;;  %s542_s4 = inlined_call_operand.vmem [shape: f32[1,256], index: 4, kind: input, shape index: {}]   ;;  %s543_s5 = inlined_call_operand.vmem [shape: f32[256,25], index: 5, kind: input, shape index: {}]   ;;  %s544_s6 = inlined_call_operand.vmem [shape: f32[1,25], index: 6, kind: input, shape index: {}]   ;;  %s545_s7 = inlined_call_operand.hbm [shape: f32[1,1], index: 7, kind: output, shape index: {}]  }
   0x1   :  { %v342_v0 = vld [vmem:[%s541_s3 + $0x4] ss:$8 sps:$4 sm:$0xff]   ;;  %v344_v1 = vld [vmem:[%s541_s3] ss:$8 sps:$4 sm:$0xff]   ;;  %101 = vmatprep.mubr.bf16.mxu0 %v364_v2  ;;  %v345_v3 = vld [vmem:[%s541_s3 + $0x14] ss:$8 sps:$4 sm:$0xff]  }
   0x2   :  { %69 = vmatprep.subr.bf16.mxu0 %v342_v0  ;;  %v347_v4 = vld [vmem:[%s541_s3 + $0x10] ss:$8 sps:$4 sm:$0xff]   ;;  %v27_v5 = vld [vmem:[%s539_s1] sm:$0xff]  ;;  %v129_v7 = vld [vmem:[%s543_s5 + $0x88] sm:$0xff] }
   0x3   :  { %70 = vmatpush1.bf16.msra.mxu0 %v344_v1  ;;  %v128_v6 = vld [vmem:[%s543_s5 + $0x80] sm:$0xff]  ;;  %v113_v10 = vld [vmem:[%s543_s5 + $0x8] sm:$0xff]  ;;  %v130_v11 = vld [vmem:[%s543_s5 + $0x90] sm:$0xff]  ;;  %v28_v18 = vpack.c.bf16 %v27_v5, %v27_v5 }
   0x4   :  { %v112_v8 = vld [vmem:[%s543_s5] sm:$0xff]  ;;  %71 = vmatprep.subr.bf16.mxu0 %v345_v3  ;;  %v306_v9 = vpack.c.bf16 %v129_v7, %v128_v6  ;;  %v131_v12 = vld [vmem:[%s543_s5 + $0x98] sm:$0xff]  ;;  %v114_v15 = vld [vmem:[%s543_s5 + $0x10] sm:$0xff] }
   0x5   :  { %v308_v13 = vpack.c.bf16 %v113_v10, %v112_v8  ;;  %v310_v14 = vpack.c.bf16 %v131_v12, %v130_v11  ;;  %v115_v16 = vld [vmem:[%s543_s5 + $0x18] sm:$0xff]  ;;  %v132_v17 = vld [vmem:[%s543_s5 + $0xa0] sm:$0xff]  ;;  %v133_v19 = vld [vmem:[%s543_s5 + $0xa8] sm:$0xff] }
   0x6   :  { %307 = vmatprep.subr.bf16.mxu1 %v306_v9  ;;  %v312_v20 = vpack.c.bf16 %v115_v16, %v114_v15  ;;  %v314_v21 = vpack.c.bf16 %v133_v19, %v132_v17  ;;  %v116_v22 = vld [vmem:[%s543_s5 + $0x20] sm:$0xff]  ;;  %v117_v23 = vld [vmem:[%s543_s5 + $0x28] sm:$0xff]  ;;  %v134_v24 = vld [vmem:[%s543_s5 + $0xb0] sm:$0xff] }
   0x7   :  { %72 = vmatpush1.bf16.msra.mxu0 %v347_v4  ;;  %309 = vmatpush3.bf16.msra.mxu1 %v308_v13  ;;  %v135_v25 = vld [vmem:[%s543_s5 + $0xb8] sm:$0xff]  ;;  %v316_v26 = vpack.c.bf16 %v117_v23, %v116_v22  ;;  %v118_v28 = vld [vmem:[%s543_s5 + $0x30] sm:$0xff] }
   0x8   :  { %311 = vmatprep.subr.bf16.mxu1 %v310_v14  ;;  %v318_v27 = vpack.c.bf16 %v135_v25, %v134_v24  ;;  %v119_v29 = vld [vmem:[%s543_s5 + $0x38] sm:$0xff] }
   0xa   :  { %269 = vmatmul.mubr.msk.bf16.vlgmr.msra.gmra.mrb[0].mxu0 %vm65_vm0, %v28_v18 }
   0xb   :  { %313 = vmatpush3.bf16.msra.mxu1 %v312_v20 }
   0xc   :  { %315 = vmatprep.subr.bf16.mxu1 %v314_v21 }
   0xd   :  { %13 = vsyncpa [#allocation5], 0  ;;  %v136_v30 = vld [vmem:[%s543_s5 + $0xc0] sm:$0xff]  ;;  %v137_v31 = vld [vmem:[%s543_s5 + $0xc8] sm:$0xff]  ;;  %v320_v32 = vpack.c.bf16 %v119_v29, %v118_v28  ;;  %v35_v55 = vlaneseq  ;;  %vm239_vm2 = vcmask 203776   ;;  %s352_s24 = scalar_lea.hbm %s545_s7, 16 }
   0xe   :  { %v322_v33 = vpack.c.bf16 %v137_v31, %v136_v30  ;;  %v120_v34 = vld [vmem:[%s543_s5 + $0x40] sm:$0xff]  ;;  %v121_v35 = vld [vmem:[%s543_s5 + $0x48] sm:$0xff]  ;;  %v138_v36 = vld [vmem:[%s543_s5 + $0xd0] sm:$0xff]  ;;  %p353_p0 = scmp.ne.s32.totalorder %s545_s7, %s352_s24  ;;  %p356_p1 = scmp.lt.u32.totalorder %s352_s24, %s545_s7 }
   0xf   :  { %317 = vmatpush3.bf16.msra.mxu1 %v316_v26  ;;  %v139_v37 = vld [vmem:[%s543_s5 + $0xd8] sm:$0xff]  ;;  %v324_v38 = vpack.c.bf16 %v121_v35, %v120_v34  ;;  %v122_v40 = vld [vmem:[%s543_s5 + $0x50] sm:$0xff]  ;;  %v140_v42 = vld [vmem:[%s543_s5 + $0xe0] sm:$0xff]  ;;  %v36_v56 = vshrl.u32 %v35_v55, 7 }
  0x10   :  { %319 = vmatprep.subr.bf16.mxu1 %v318_v27  ;;  %v326_v39 = vpack.c.bf16 %v139_v37, %v138_v36  ;;  %v123_v41 = vld [vmem:[%s543_s5 + $0x58] sm:$0xff]  ;;  %v141_v43 = vld [vmem:[%s543_s5 + $0xe8] sm:$0xff]  ;;  %v124_v46 = vld [vmem:[%s543_s5 + $0x60] sm:$0xff]  ;;  %p358_p2 = pnand %p356_p1, %p353_p0 }
  0x11   :  { %v328_v44 = vpack.c.bf16 %v123_v41, %v122_v40  ;;  %v330_v45 = vpack.c.bf16 %v141_v43, %v140_v42  ;;  %v125_v47 = vld [vmem:[%s543_s5 + $0x68] sm:$0xff]  ;;  %v142_v49 = vld [vmem:[%s543_s5 + $0xf0] sm:$0xff]  ;;  %v143_v50 = vld [vmem:[%s543_s5 + $0xf8] sm:$0xff]  ;;  %v37_v57 = vsub.s32 0, %v36_v56  ;;  %v41_v59 = vsub.s32 1, %v36_v56 }
  0x12   :  { %v332_v48 = vpack.c.bf16 %v125_v47, %v124_v46  ;;  %v334_v51 = vpack.c.bf16 %v143_v50, %v142_v49  ;;  %v126_v52 = vld [vmem:[%s543_s5 + $0x70] sm:$0xff]  ;;  %v127_v53 = vld [vmem:[%s543_s5 + $0x78] sm:$0xff]  ;;  %v33_v58 = vld [vmem:[%s542_s4] sm:$0x3] }
  0x13   :  { %321 = vmatpush3.bf16.msra.mxu1 %v320_v32  ;;  %v336_v54 = vpack.c.bf16 %v127_v53, %v126_v52  ;;  %v38_v60 = vrot.slane %v33_v58, %v37_v57  ;;  %v42_v61 = vrot.slane %v33_v58, %v41_v59  ;;  %v270_v7 = vld [vmem:[%s544_s6] ss:$0 sm:$0xff] }
  0x14   :  { %323 = vmatprep.subr.bf16.mxu1 %v322_v33  ;;  %v221_v17 = vld [vmem:[%s540_s2] sm:$0xff] }
  0x17   :  { %325 = vmatpush3.bf16.msra.mxu1 %v324_v38 }
  0x18   :  { %327 = vmatprep.subr.bf16.mxu1 %v326_v39 }
  0x1b   :  { %329 = vmatpush3.bf16.msra.mxu1 %v328_v44 }
  0x1c   :  { %331 = vmatprep.subr.bf16.mxu1 %v330_v45 }
  0x1f   :  { %333 = vmatpush3.bf16.msra.mxu1 %v332_v48 }
  0x20   :  { %335 = vmatprep.subr.bf16.mxu1 %v334_v51 }
  0x23   :  { %337 = vmatpush3.bf16.msra.mxu1 %v336_v54 }
  0xdd   :  { %v103_v62 = vpop.f32.mrb[0].mxu0 }
  0xde   :  { %v104_v63 = vadd.f32 %v103_v62, %v38_v60  ;;  %v105_v0 = vpop.f32.mrb[1].mxu0 }
  0xdf   :  { %v107_v1 = vpop.f32.mrb[2].mxu0  ;;  %v106_v2 = vadd.f32 %v105_v0, %v42_v61 }
  0xe0   :  { %v108_v3 = vpop.f32.mrb[3].mxu0  ;;  %v110_v5 = vmax.f32 %v104_v63, 0.0 }
  0xe1   :  { %v111_v4 = vmax.f32 %v106_v2, 0.0 }
  0xe3   :  { %215 = vmatprep.mubr.f32.mxu1 %v111_v4 }
  0xe4   :  { %216 = vmatmul.mubr.f32.vlgmr.msra.gmra.mrb[0].mxu1 %v110_v5 }
 0x1b7   :  { %v303_v6 = vpop.f32.mrb[0].mxu1 }
 0x1b8   :  { %v304_v8 = vpop.f32.mrb[1].mxu1 }
 0x1b9   :  { %v305_v9 = vadd.f32 %v304_v8, %v303_v6 }
 0x1bb   :  { %v218_v10 = vadd.f32 %v305_v9, %v270_v7 }
 0x1bd   :  { %v225_v11 = vand.u32 2147483647, %v218_v10  ;;  %v222_v19 = vmax.f32 %v218_v10, 0.0  ;;  %v223_v20 = vmul.f32 %v221_v17, %v218_v10 }
 0x1bf   :  { %v226_v12 = vsub.f32 0.0, %v225_v11  ;;  %v224_v25 = vsub.f32 %v222_v19, %v223_v20 }
 0x1c1   :  { %v227_v13 = vmul.f32 1.442695, %v226_v12 }
 0x1c3   :  { %348 = vpow2.f32 %v227_v13 }
 0x1cd   :  { %v349_v14 = vpop.eup %348 }
 0x1ce   :  { %v229_v15 = vadd.f32 1.0, %v349_v14  ;;  %v232_v16 = vmul.f32 -0.5, %v349_v14  ;;  %v235_v21 = vand.u32 2147483647, %v349_v14 }
 0x1d0   :  { %350 = vlog2.f32 %v229_v15  ;;  %v233_v18 = vadd.f32 1.0, %v232_v16  ;;  %vm236_vm1 = vcmp.lt.f32.partialorder %v235_v21, 0.0004427343 }
 0x1d2   :  { %v234_v24 = vmul.f32 %v349_v14, %v233_v18 }
 0x1da   :  { %v351_v22 = vpop.eup %350 }
 0x1db   :  { %v231_v23 = vmul.f32 0.6931472, %v351_v22 }
 0x1dd   :  { %v237_v26 = vsel %vm236_vm1, %v234_v24, %v231_v23 }
 0x1de   :  { %v238_v27 = vadd.f32 %v237_v26, %v224_v25 }
 0x1e0   :  { %v240_v28 = vsel %vm239_vm2, %v238_v27, 0.0 }
 0x1e1   :  { %241 = vadd.xlane.f32.xlu0 %v240_v28 }
 0x26e   :  { %v242_v29 = vpop.xlane.xlu0 %241 }
 0x26f   :  { %v243_v30 = vrot.slane %v242_v29, 4 }
 0x271   :  { %v244_v31 = vadd.f32 %v243_v30, %v242_v29 }
 0x273   :  { %v245_v32 = vrot.slane %v244_v31, 2 }
 0x275   :  { %v246_v33 = vadd.f32 %v245_v32, %v244_v31 }
 0x277   :  { %v247_v34 = vrot.slane %v246_v33, 1 }
 0x279   :  { %v248_v35 = vadd.f32 %v247_v34, %v246_v33 }
 0x27b   :  { %338 = vpush %v248_v35 }
 0x2ac   :  { %s339_s2 = spop %338 }
 0x2ad   :  { %251 = sst [smem:[#allocation4]] %s339_s2 }
 0x2ae   :  { %361 = shalt.err (!%p358_p2)
}
 0x2af   :  { %s365_s29 = smov [#allocation4]  }
 0x2b0   :  { %259 = dma.smem_to_hbm %s365_s29, 16, %s545_s7, [#allocation5]  }
 0x2b1   :  { %362 = dma.done.wait [#allocation5], 16  }
 0x2b2   :  { %363 = vsyncadd [#allocation5], 4294967280 }
 0x2b3   :  { %263 = sfence }
 0x2b4   :  { %264 = vsyncpa [#allocation5], 1 }

</bundles_post_ra>
